<compile_context>
chip_gen: v6e
topology: v6e:2x2x1
jax: 0.10.0
libtpu: 0.0.40
codegen_flags: <defaults>
</compile_context>

<pallas_src>
import functools
import math

import jax
import jax.numpy as jnp
from jax.experimental import pallas as pl
from jax.experimental.pallas import tpu as pltpu


def _round_up(x: int, m: int) -> int:
    return ((x + m - 1) // m) * m


def _reference(time: jax.Array, dim: int) -> jax.Array:
    """Pure-JAX reference (identical math to the PyTorch module)."""
    half_dim = dim // 2
    emb = math.log(10000.0) / (half_dim - 1)
    emb = jnp.exp(jnp.arange(half_dim, dtype=jnp.float32) * -emb)
    emb = time.astype(jnp.float32)[:, None] * emb[None, :]
    return jnp.concatenate([jnp.sin(emb), jnp.cos(emb)], axis=-1)


def _sinusoidal_kernel(time_ref, w_ref, sel_ref, out_ref, *, k: int):
    """One batch tile, lane-dense output.

    time_ref: (TR, k)  f32  -- k consecutive timesteps packed per output row
    w_ref:    (k, L)   f32  -- W[j, j*dim + c] = freqs_full[c] (one nonzero/lane)
    sel_ref:  (1, L)   f32  -- 1.0 on sin lanes, 0.0 on cos lanes
    out_ref:  (TR, L)  out dtype
    """
    t = time_ref[...]
    w = w_ref[...]
    # Exact lane-expansion: every output lane has exactly one nonzero weight, so
    # the sum of broadcast products equals the single f32 product time * freq
    # exactly (adding 0.0 terms is exact).  Pure VPU work, MXU stays idle.
    args = t[:, 0:1] * w[0:1, :]
    for j in range(1, k):
        args = args + t[:, j:j + 1] * w[j:j + 1, :]
    # One unmasked full-width store; mask-select keeps cos bit-exact.
    out = jnp.where(sel_ref[...] != 0.0, jnp.sin(args), jnp.cos(args))
    out_ref[...] = out.astype(out_ref.dtype)


def sinusoidal_position_embeddings(
    time: jax.Array,
    dim: int,
    *,
    out_dtype=jnp.float32,
    use_pallas=None,
    vmem_budget_bytes: int = 10 * 1024 * 1024,
) -> jax.Array:
    """JAX/Pallas equivalent of SinusoidalPositionEmbeddings(dim)(time).

    time: shape (B,); returns (B, dim) in `out_dtype` (math is f32).
    use_pallas: None -> auto (Pallas only for large inputs); True/False forces.
    """
    assert time.ndim == 1, "expected time of shape (B,)"
    assert dim % 2 == 0, "dim must be even"
    assert dim >= 4, "dim must be >= 4 (half_dim - 1 > 0)"

    b = time.shape[0]
    half_dim = dim // 2

    if use_pallas is None:
        # Tiny inputs (the module's typical per-step call) are launch-overhead
        # dominated: leave them to XLA so they can fuse into the consumer.
        use_pallas = b * dim >= (1 << 16)
    if not use_pallas:
        # TODO(synk): fuse into the consumer (first Linear of the time MLP).
        return _reference(time, dim).astype(out_dtype)

    # ---- output layout: pack k batch rows per 128-lane output row ----------
    lane = 128
    if dim < lane and lane % dim == 0:
        L = lane
        k = L // dim          # e.g. dim=32 -> k=4
    else:
        L = dim               # dim >= 128 (dense if multiple of 128) or awkward dim
        k = 1

    # ---- frequency / selection tables (tiny, computed once wrapper-side) ---
    scale = math.log(10000.0) / (half_dim - 1)
    freqs = jnp.exp(jnp.arange(half_dim, dtype=jnp.float32) * (-scale))   # (half_dim,)
    freqs_full = jnp.concatenate([freqs, freqs])                           # (dim,)
    if k == 1:
        w = freqs_full.reshape(1, dim)
    else:
        # W[j, j*dim + c] = freqs_full[c], zero elsewhere.
        w = (jnp.eye(k, dtype=jnp.float32)[:, :, None]
             * freqs_full[None, None, :]).reshape(k, L)
    sel = ((jnp.arange(L, dtype=jnp.int32) % dim) < half_dim)
    sel = sel.astype(jnp.float32).reshape(1, L)

    # ---- batch tiling --------------------------------------------------------
    rows = pl.cdiv(max(b, 1), k)          # lane-dense output rows needed
    rows_up8 = _round_up(rows, 8)

    out_item = jnp.dtype(out_dtype).itemsize
    # Double-buffered VMEM per row: output row + one (8,128) f32 time lane-tile
    # shared by 8 rows (the (TR, k) block pads to 128 lanes in VMEM).
    per_row = _round_up(L, 128) * out_item + 512
    cap = max(8, (vmem_budget_bytes // (2 * per_row)) // 8 * 8)

    tr = min(cap, rows_up8)
    # v7x has 2 TensorCores: with enough work, ensure >= 2 grid steps so the
    # "parallel" batch axis lands on both cores (harmless on v5e/v6e).
    if rows_up8 >= 16:
        tr = min(tr, _round_up(pl.cdiv(rows_up8, 2), 8))
    tr = max(8, (tr // 8) * 8)

    rows_pad = _round_up(rows_up8, tr)
    num_tiles = rows_pad // tr
    b_pad = rows_pad * k

    # ---- inputs --------------------------------------------------------------
    time_f32 = time.astype(jnp.float32)
    if b_pad != b:
        time_f32 = jnp.pad(time_f32, (0, b_pad - b))
    time2d = time_f32.reshape(rows_pad, k)

    out = pl.pallas_call(
        functools.partial(_sinusoidal_kernel, k=k),
        out_shape=jax.ShapeDtypeStruct((rows_pad, L), out_dtype),
        grid=(num_tiles,),
        in_specs=[
            pl.BlockSpec((tr, k), lambda i: (i, 0)),
            pl.BlockSpec((k, L), lambda i: (0, 0)),
            pl.BlockSpec((1, L), lambda i: (0, 0)),
        ],
        out_specs=pl.BlockSpec((tr, L), lambda i: (i, 0)),
        compiler_params=pltpu.CompilerParams(
            dimension_semantics=("parallel",),
        ),
    )(time2d, w, sel)

    # Free (row-major contiguous) reshape back to the (B, dim) module layout.
    out = out.reshape(b_pad, dim)
    if b_pad != b:
        # TODO(synk): large-B consumers that accept a padded batch should take
        # the (b_pad, dim) array directly to avoid this slice copy.
        out = out[:b]
    return out


if __name__ == "__main__":
    key = jax.random.PRNGKey(0)

    def tcase(i, n):
        k = jax.random.fold_in(key, i)
        return jax.random.uniform(k, (n,), dtype=jnp.float32, minval=0.0, maxval=1000.0)

    # Case A: typical diffusion-timestep shape, forced through the Pallas kernel
    # (lane-dense packed path, single tile).
    B, DIM = 8, 32
    time_a = tcase(0, B)
    out_a = jax.block_until_ready(sinusoidal_position_embeddings(time_a, DIM, use_pallas=True))
    ref_a = _reference(time_a, DIM)
    assert out_a.shape == (B, DIM), out_a.shape
    assert jnp.allclose(out_a, ref_a, atol=1e-5, rtol=1e-5), "mismatch (case A)"

    # Case B: batch not a multiple of the packing factor (padding + slice path).
    B2, DIM2 = 18, 32
    time_b = tcase(1, B2)
    out_b = jax.block_until_ready(sinusoidal_position_embeddings(time_b, DIM2, use_pallas=True))
    ref_b = _reference(time_b, DIM2)
    assert out_b.shape == (B2, DIM2), out_b.shape
    assert jnp.allclose(out_b, ref_b, atol=1e-5, rtol=1e-5), "mismatch (case B)"

    # Case C: larger batch -> auto policy picks Pallas, multi-tile grid
    # (>= 2 tiles so both v7x TensorCores participate).
    B3, DIM3 = 4096, 32
    time_c = tcase(2, B3)
    out_c = jax.block_until_ready(sinusoidal_position_embeddings(time_c, DIM3))
    ref_c = _reference(time_c, DIM3)
    assert out_c.shape == (B3, DIM3), out_c.shape
    assert jnp.allclose(out_c, ref_c, atol=1e-5, rtol=1e-5), "mismatch (case C)"

    # Case C-bf16: bf16 output (math stays f32), looser tolerance.
    out_c16 = jax.block_until_ready(
        sinusoidal_position_embeddings(time_c, DIM3, out_dtype=jnp.bfloat16))
    assert out_c16.dtype == jnp.bfloat16
    assert jnp.allclose(out_c16.astype(jnp.float32), ref_c, atol=2e-2), "mismatch (case C bf16)"

    # Case D: dim that does not divide 128 -> k=1 fallback layout.
    B4, DIM4 = 16, 20
    time_d = tcase(3, B4)
    out_d = jax.block_until_ready(sinusoidal_position_embeddings(time_d, DIM4, use_pallas=True))
    ref_d = _reference(time_d, DIM4)
    assert out_d.shape == (B4, DIM4), out_d.shape
    assert jnp.allclose(out_d, ref_d, atol=1e-5, rtol=1e-5), "mismatch (case D)"

    # Case E: tiny input with default policy -> XLA path (fusable in consumer).
    out_e = jax.block_until_ready(sinusoidal_position_embeddings(time_a, DIM))
    assert out_e.shape == (B, DIM)
    assert jnp.allclose(out_e, ref_a, atol=1e-5, rtol=1e-5), "mismatch (case E)"

    print("KERNEL_OK")
</pallas_src>

<mosaic_0001>
module attributes {stable_mosaic.version = 11 : i64} {
  func.func @_sinusoidal_kernel(%arg0: i32, %arg1: memref<8x4xf32, #tpu.memory_space<vmem>>, %arg2: memref<4x128xf32, #tpu.memory_space<vmem>>, %arg3: memref<1x128xf32, #tpu.memory_space<vmem>>, %arg4: memref<8x128xf32, #tpu.memory_space<vmem>>) attributes {dimension_semantics = [#tpu.dimension_semantics<parallel>], iteration_bounds = array<i64: 1>, scalar_prefetch = 0 : i64, scratch_operands = 0 : i64, tpu.core_type = #tpu.core_type<tc>, window_params = [{transform_indices = @transform_0, window_bounds = array<i64: 8, 4>}, {pipeline_mode = #tpu.pipeline_mode<synchronous>, transform_indices = @transform_1, window_bounds = array<i64: 4, 128>}, {pipeline_mode = #tpu.pipeline_mode<synchronous>, transform_indices = @transform_2, window_bounds = array<i64: 1, 128>}, {transform_indices = @transform_3, window_bounds = array<i64: 8, 128>}]} {
    %c0 = arith.constant 0 : index
    %c0_0 = arith.constant 0 : index
    %0 = vector.load %arg1[%c0, %c0_0] : memref<8x4xf32, #tpu.memory_space<vmem>>, vector<8x4xf32>
    %c0_1 = arith.constant 0 : index
    %c0_2 = arith.constant 0 : index
    %1 = vector.load %arg2[%c0_1, %c0_2] : memref<4x128xf32, #tpu.memory_space<vmem>>, vector<4x128xf32>
    %2 = vector.extract_strided_slice %0 {offsets = [0, 0], sizes = [8, 1], strides = [1, 1]} : vector<8x4xf32> to vector<8x1xf32>
    %3 = vector.extract_strided_slice %1 {offsets = [0, 0], sizes = [1, 128], strides = [1, 1]} : vector<4x128xf32> to vector<1x128xf32>
    %4 = vector.broadcast %2 : vector<8x1xf32> to vector<8x128xf32>
    %5 = vector.broadcast %3 : vector<1x128xf32> to vector<8x128xf32>
    %6 = arith.mulf %4, %5 : vector<8x128xf32>
    %7 = vector.extract_strided_slice %0 {offsets = [0, 1], sizes = [8, 1], strides = [1, 1]} : vector<8x4xf32> to vector<8x1xf32>
    %8 = vector.extract_strided_slice %1 {offsets = [1, 0], sizes = [1, 128], strides = [1, 1]} : vector<4x128xf32> to vector<1x128xf32>
    %9 = vector.broadcast %7 : vector<8x1xf32> to vector<8x128xf32>
    %10 = vector.broadcast %8 : vector<1x128xf32> to vector<8x128xf32>
    %11 = arith.mulf %9, %10 : vector<8x128xf32>
    %12 = arith.addf %6, %11 : vector<8x128xf32>
    %13 = vector.extract_strided_slice %0 {offsets = [0, 2], sizes = [8, 1], strides = [1, 1]} : vector<8x4xf32> to vector<8x1xf32>
    %14 = vector.extract_strided_slice %1 {offsets = [2, 0], sizes = [1, 128], strides = [1, 1]} : vector<4x128xf32> to vector<1x128xf32>
    %15 = vector.broadcast %13 : vector<8x1xf32> to vector<8x128xf32>
    %16 = vector.broadcast %14 : vector<1x128xf32> to vector<8x128xf32>
    %17 = arith.mulf %15, %16 : vector<8x128xf32>
    %18 = arith.addf %12, %17 : vector<8x128xf32>
    %19 = vector.extract_strided_slice %0 {offsets = [0, 3], sizes = [8, 1], strides = [1, 1]} : vector<8x4xf32> to vector<8x1xf32>
    %20 = vector.extract_strided_slice %1 {offsets = [3, 0], sizes = [1, 128], strides = [1, 1]} : vector<4x128xf32> to vector<1x128xf32>
    %21 = vector.broadcast %19 : vector<8x1xf32> to vector<8x128xf32>
    %22 = vector.broadcast %20 : vector<1x128xf32> to vector<8x128xf32>
    %23 = arith.mulf %21, %22 : vector<8x128xf32>
    %24 = arith.addf %18, %23 : vector<8x128xf32>
    %c0_3 = arith.constant 0 : index
    %c0_4 = arith.constant 0 : index
    %25 = vector.load %arg3[%c0_3, %c0_4] : memref<1x128xf32, #tpu.memory_space<vmem>>, vector<1x128xf32>
    %cst = arith.constant 0.000000e+00 : f32
    %26 = vector.broadcast %cst : f32 to vector<1x128xf32>
    %27 = arith.cmpf one, %25, %26 : vector<1x128xf32>
    %28 = math.sin %24 : vector<8x128xf32>
    %29 = math.cos %24 : vector<8x128xf32>
    %30 = vector.shape_cast %27 : vector<1x128xi1> to vector<1x128xi1>
    %31 = vector.broadcast %30 : vector<1x128xi1> to vector<8x128xi1>
    %32 = arith.select %31, %28, %29 : vector<8x128xi1>, vector<8x128xf32>
    %c0_5 = arith.constant 0 : index
    %c0_6 = arith.constant 0 : index
    %33 = vector.load %arg4[%c0_5, %c0_6] : memref<8x128xf32, #tpu.memory_space<vmem>>, vector<8x128xf32>
    tpu.vector_store %arg4[%c0_5, %c0_6], %32 {strides = array<i32>} : memref<8x128xf32, #tpu.memory_space<vmem>>, vector<8x128xf32>,
    return
  }
  func.func @transform_0(%arg0: i32) -> (i32, i32) {
    %c0_i32 = arith.constant 0 : i32
    %c0_i32_0 = arith.constant 0 : i32
    return %arg0, %c0_i32 : i32, i32
  }
  func.func @transform_1(%arg0: i32) -> (i32, i32) {
    %c0_i32 = arith.constant 0 : i32
    %c0_i32_0 = arith.constant 0 : i32
    %c0_i32_1 = arith.constant 0 : i32
    return %c0_i32, %c0_i32_0 : i32, i32
  }
  func.func @transform_2(%arg0: i32) -> (i32, i32) {
    %c0_i32 = arith.constant 0 : i32
    %c0_i32_0 = arith.constant 0 : i32
    %c0_i32_1 = arith.constant 0 : i32
    return %c0_i32, %c0_i32_0 : i32, i32
  }
  func.func @transform_3(%arg0: i32) -> (i32, i32) {
    %c0_i32 = arith.constant 0 : i32
    %c0_i32_0 = arith.constant 0 : i32
    return %arg0, %c0_i32 : i32, i32
  }
}

</mosaic_0001>

<bundles_post_ra>
// kernel: tpu_custom_call.1
= control target key start
LH: loop header
LB: loop body
LE: loop exit
PB: predicated region body
PF: predicated region fallthrough
CT: control target
= control target key end

     0   :  { %v22_v0 = vlaneseq  ;;  %v342_v3 = vmov 0   ;;  %v343_v4 = vmov 2   ;;  %s411_s0 = inlined_call_operand.vmem [shape: f32[8,4], index: 0, kind: input, shape index: {}]   ;;  %s412_s1 = inlined_call_operand.vmem [shape: f32[4,128], index: 1, kind: input, shape index: {}]   ;;  %s413_s2 = inlined_call_operand.vmem [shape: f32[1,128], index: 2, kind: input, shape index: {}]   ;;  %s414_s3 = inlined_call_operand.hbm [shape: f32[8,128], index: 3, kind: output, shape index: {}]  }
   0x1   :  { %v57_v1 = vld [vmem:[%s413_s2] sm:$0x1]  ;;  %311 = vset.pattern.permute.xlu0 %v342_v3  ;;  %313 = vset.pattern.permute.xlu1 %v343_v4 }
   0x2   :  { %v15_v2 = vld [vmem:[%s411_s0] sm:$0xff]  ;;  %vm58_vm0 = vcmp.ne.f32.partialorder %v57_v1, 0.0 }
   0x3   :  { %8 = vsyncpa [#allocation3], 0  ;;  %v23_v5 = vshrl.u32 %v22_v0, 7  ;;  %19 = vperm.xlu0 %311, %v15_v2   ;;  %38 = vperm.xlu1 %313, %v15_v2   ;;  %v266_v6 = vsel %vm58_vm0, 1, %v342_v3  ;;  %v344_v9 = vmov 1   ;;  %v345_v10 = vmov 3  }
   0x4   :  { %v16_v12 = vld [vmem:[%s412_s1] sm:$0xf]  ;;  %v346_v40 = vmov 683565275   ;;  %v347_v42 = vmov 2475754826  }
   0x5   :  { %v24_v7 = vsub.s32 0, %v23_v5  ;;  %v33_v11 = vsub.s32 1, %v23_v5  ;;  %v43_v14 = vsub.s32 2, %v23_v5  ;;  %v53_v16 = vsub.s32 3, %v23_v5  ;;  %s352_s1 = smov [#allocation2]  }
   0x6   :  { %v348_v45 = vmov 2131351028   ;;  %v349_v48 = vmov 2102212464   ;;  %v350_v51 = vmov 920167782  }
   0x7   :  { %v379_v8 = vrot.slane %v266_v6, %v24_v7  ;;  %312 = vset.pattern.permute.xlu0 %v344_v9  ;;  %314 = vset.pattern.permute.xlu1 %v345_v10  ;;  %v25_v17 = vrot.slane %v16_v12, %v24_v7  ;;  %v34_v18 = vrot.slane %v16_v12, %v33_v11  ;;  %v351_v54 = vmov 1326507024   ;;  %s280_s16 = sshll.u32 %s352_s1, 4  ;;  %s281_s16 = int_to_ptr.vmem [resolvable:$true] %s280_s16 }
   0x8   :  { %28 = vperm.xlu0 %312, %v15_v2   ;;  %48 = vperm.xlu1 %314, %v15_v2   ;;  %v44_v19 = vrot.slane %v16_v12, %v43_v14  ;;  %v54_v20 = vrot.slane %v16_v12, %v53_v16  ;;  %s320_s17 = scalar_lea.vmem %s281_s16, 128  ;;  %p325_p1 = scmp.lt.s32.totalorder %s281_s16, %s281_s16 }
   0x9   :  { %vm271_vm10 = vcmp.eq.s32.totalorder %v379_v8, 1  ;;  %p321_p0 = scmp.ne.s32.totalorder %s281_s16, %s320_s17  ;;  %p326_p2 = scmp.lt.s32.totalorder %s320_s17, %s320_s17 }
   0xb   :  { %p327_p3 = por %p326_p2, %p325_p1 }
   0xc   :  { %315 = vset.pattern.permute.xlu0 %v345_v10 }
   0xd   :  { %p328_p4 = pnand %p327_p3, %p321_p0 }
  0x7e   :  { %v20_v13 = vpop.permute.xlu0 %19  ;;  %v39_v15 = vpop.permute.xlu1 %38 }
  0x7f   :  { %v26_v23 = vmul.f32 %v25_v17, %v20_v13  ;;  %v45_v25 = vmul.f32 %v44_v19, %v39_v15 }
  0x83   :  { %v29_v21 = vpop.permute.xlu0 %28  ;;  %v49_v22 = vpop.permute.xlu1 %48 }
  0x84   :  { %v35_v24 = vmul.f32 %v34_v18, %v29_v21  ;;  %v55_v27 = vmul.f32 %v54_v20, %v49_v22 }
  0x86   :  { %v36_v26 = vadd.f32 %v35_v24, %v26_v23 }
  0x88   :  { %v46_v28 = vadd.f32 %v45_v25, %v36_v26 }
  0x8a   :  { %v384_v29 = vadd.f32 %v55_v27, %v46_v28 }
  0x8c   :  { %v62_v30 = vand.u32 2139095040, %v384_v29  ;;  %v59_v34 = vand.u32 2147483647, %v384_v29  ;;  %vm61_vm8 = vcmp.lt.s32.totalorder %v384_v29, 0 }
  0x8e   :  { %v63_v31 = vshrl.u32 %v62_v30, 23  ;;  %v66_v37 = vand.u32 8388607, %v59_v34  ;;  %vm60_vm9 = vcmp.le.f32.partialorder %v59_v34, 0.7853982 }
  0x90   :  { %v288_v32 = vadd.s32 4294967169, %v63_v31  ;;  %v67_v56 = vor.u32 8388608, %v66_v37 }
  0x92   :  { %v69_v33 = vadd.s32 1, %v288_v32  ;;  %v107_v6 = vshll.u32 %v67_v56, 8 }
  0x94   :  { %vm70_vm1 = vcmp.gt.s32.totalorder %v69_v33, 0 }
  0x95   :  { %v71_v35 = vsel %vm70_vm1, %v69_v33, 0  ;;  %vm151_vm1 = vweird.f32 %v384_v29 }
  0x96   :  { %v73_v36 = vand.u32 31, %v71_v35  ;;  %v72_v39 = vshrl.u32 %v71_v35, 5 }
  0x98   :  { %v74_v38 = vsub.s32 32, %v73_v36  ;;  %v76_v41 = vshll.u32 %v346_v40, %v73_v36  ;;  %v79_v43 = vshll.u32 %v347_v42, %v73_v36  ;;  %v82_v47 = vshll.u32 %v348_v45, %v73_v36 }
  0x99   :  { %v85_v50 = vshll.u32 %v349_v48, %v73_v36  ;;  %v88_v53 = vshll.u32 %v350_v51, %v73_v36  ;;  %vm91_vm2 = vcmp.lt.s32.totalorder %v72_v39, 1  ;;  %vm94_vm3 = vcmp.lt.s32.totalorder %v72_v39, 4 }
  0x9a   :  { %v77_v44 = vshrl.u32 %v347_v42, %v74_v38  ;;  %v80_v46 = vshrl.u32 %v348_v45, %v74_v38  ;;  %v83_v49 = vshrl.u32 %v349_v48, %v74_v38  ;;  %v86_v52 = vshrl.u32 %v350_v51, %v74_v38 }
  0x9b   :  { %v89_v55 = vshrl.u32 %v351_v54, %v74_v38  ;;  %v75_v1 = vshrl.u32 %v346_v40, %v74_v38  ;;  %vm93_vm4 = vcmp.lt.s32.totalorder %v72_v39, 3  ;;  %vm92_vm5 = vcmp.lt.s32.totalorder %v72_v39, 2 }
  0x9c   :  { %v78_v57 = vor.u32 %v77_v44, %v76_v41  ;;  %v81_v58 = vor.u32 %v80_v46, %v79_v43  ;;  %v84_v59 = vor.u32 %v83_v49, %v82_v47  ;;  %v87_v60 = vor.u32 %v86_v52, %v85_v50 }
  0x9d   :  { %v90_v61 = vor.u32 %v89_v55, %v88_v53 }
  0x9e   :  { %v96_v62 = vsel %vm94_vm3, %v84_v59, 2102212464  ;;  %v99_v63 = vsel %vm91_vm2, %v78_v57, %v81_v58  ;;  %v103_v0 = vsel %vm91_vm2, %v81_v58, %v84_v59  ;;  %v100_v2 = vsel %vm94_vm3, %v87_v60, 920167782 }
  0x9f   :  { %v104_v3 = vsel %vm94_vm3, %v90_v61, 1326507024  ;;  %v101_v4 = vsel %vm93_vm4, %v84_v59, %v100_v2  ;;  %v95_v7 = vsel %vm91_vm2, %v75_v1, %v78_v57  ;;  %v97_v9 = vsel %vm93_vm4, %v81_v58, %v96_v62 }
  0xa0   :  { %v105_v5 = vsel %vm93_vm4, %v87_v60, %v104_v3  ;;  %v102_v10 = vsel %vm92_vm5, %v99_v63, %v101_v4  ;;  %v98_v16 = vsel %vm92_vm5, %v95_v7, %v97_v9 }
  0xa1   :  { %v106_v11 = vsel %vm92_vm5, %v103_v0, %v105_v5  ;;  %v393_v14 = vmul.u32.u64.low %v107_v6, %v102_v10  ;;  %v394_v15 = vmul.u32.u64.high %v107_v6, %v102_v10, %v393_v14  ;;  %v114_v18 = vmul.u32 %v107_v6, %v98_v16 }
  0xa2   :  { %v390_v12 = vmul.u32.u64.low %v107_v6, %v106_v11  ;;  %v391_v13 = vmul.u32.u64.high %v107_v6, %v106_v11, %v390_v12 }
  0xa3   :  { %v117_v17 = vadd.s32 1, %v394_v15 }
  0xa4   :  { %vm116_vm6 = vc.u32 %v391_v13, %v393_v14  ;;  %v115_v31 = vadd.s32 %v393_v14, %v391_v13 }
  0xa5   :  { %v118_v19 = vsel %vm116_vm6, %v117_v17, %v394_v15 }
  0xa6   :  { %v119_v20 = vadd.s32 %v118_v19, %v114_v18 }
  0xa8   :  { %v120_v21 = vadd.s32 536870912, %v119_v20 }
  0xaa   :  { %v121_v22 = vshrl.u32 %v120_v21, 30 }
  0xac   :  { %v122_v23 = vshll.u32 %v121_v22, 30  ;;  %v145_v45 = vsub.s32 4, %v121_v22 }
  0xae   :  { %v123_v24 = vsub.s32 %v119_v20, %v122_v23  ;;  %v146_v48 = vsel %vm61_vm8, %v145_v45, %v121_v22 }
  0xaf   :  { %v148_v49 = vsel %vm60_vm9, 0, %v146_v48 }
  0xb0   :  { %v125_v25 = vsub.s32 0, %v123_v24  ;;  %v152_v50 = vadd.s32 3, %v148_v49  ;;  %v256_v52 = vand.u32 3, %v148_v49 }
  0xb2   :  { %v289_v26 = vmin.u32 %v125_v25, %v123_v24  ;;  %v153_v51 = vand.u32 3, %v152_v50  ;;  %vm261_vm12 = vcmp.eq.s32.totalorder %v256_v52, 2  ;;  %vm258_vm14 = vcmp.eq.s32.totalorder %v256_v52, 0 }
  0xb3   :  { %vm257_vm0 = vcmp.lt.s32.totalorder %v256_v52, 2 }
  0xb4   :  { %v127_v27 = vclz %v289_v26  ;;  %vm158_vm11 = vcmp.eq.s32.totalorder %v153_v51, 2  ;;  %vm155_vm13 = vcmp.eq.s32.totalorder %v153_v51, 0  ;;  %vm154_vm15 = vcmp.lt.s32.totalorder %v153_v51, 2 }
  0xb6   :  { %v290_v28 = vadd.s32 4294967294, %v127_v27 }
  0xb8   :  { %vm291_vm7 = vcmp.lt.s32.totalorder %v290_v28, 0 }
  0xb9   :  { %v130_v30 = vsel %vm291_vm7, 0, %v290_v28 }
  0xba   :  { %v131_v32 = vsub.s32 32, %v130_v30  ;;  %v135_v33 = vsub.s32 4294967266, %v130_v30  ;;  %v132_v35 = vshll.u32 %v123_v24, %v130_v30 }
  0xbc   :  { %v133_v36 = vshrl.u32 %v115_v31, %v131_v32  ;;  %v136_v37 = vadd.s32 127, %v135_v33 }
  0xbe   :  { %v134_v38 = vor.u32 %v133_v36, %v132_v35  ;;  %v137_v39 = vshll.u32 %v136_v37, 23 }
  0xc0   :  { %v138_v40 = vor.u32 4788187, %v137_v39  ;;  %v141_v42 = vcvt.s32.f32 %v134_v38 }
  0xc2   :  { %v139_v41 = vand.u32 2147483647, %v138_v40 }
  0xc4   :  { %v142_v43 = vmul.f32 %v141_v42, %v139_v41 }
  0xc6   :  { %v143_v44 = vxor.u32 2147483648, %v142_v43 }
  0xc8   :  { %v144_v46 = vsel %vm61_vm8, %v143_v44, %v142_v43 }
  0xc9   :  { %v147_v47 = vsel %vm60_vm9, %v384_v29, %v144_v46 }
  0xca   :  { %316 = vcosq.f32 %v147_v47 }
  0xcb   :  { %318 = vsinq.f32 %v147_v47 }
  0xd7   :  { %v317_v53 = vpop.eup %316 }
  0xd8   :  { %v319_v54 = vpop.eup %318  ;;  %v159_v55 = vxor.u32 2147483648, %v317_v53 }
  0xd9   :  { %v156_v56 = vxor.u32 2147483648, %v319_v54 }
  0xda   :  { %v160_v57 = vsel %vm158_vm11, %v159_v55, %v319_v54  ;;  %v263_v34 = vsel %vm261_vm12, %v159_v55, %v319_v54 }
  0xdb   :  { %v157_v58 = vsel %vm155_vm13, %v317_v53, %v156_v56  ;;  %v260_v59 = vsel %vm258_vm14, %v317_v53, %v156_v56 }
  0xdc   :  { %v161_v60 = vsel %vm154_vm15, %v157_v58, %v160_v57  ;;  %v264_v61 = vsel %vm257_vm0, %v260_v59, %v263_v34 }
  0xdd   :  { %v162_v62 = vsel %vm151_vm1, nan, %v161_v60  ;;  %v265_v63 = vsel %vm151_vm1, nan, %v264_v61 }
  0xde   :  { %v272_v0 = vsel %vm271_vm10, %v162_v62, %v265_v63 }
  0xdf   :  { %273 = vst [vmem:[#allocation2] sm:$0xff] %v272_v0 }
  0xe0   :  { %331 = shalt.err (!%p328_p4)
}
  0xe1   :  { %283 = dma.vmem_to_hbm [thread:$0]  %s281_s16, 128, %s414_s3, [#allocation3]  }
  0xe2   :  { %340 = dma.done.wait [#allocation3], 128  }
  0xe3   :  { %341 = vsyncadd [#allocation3], 4294967168 }
  0xe4   :  { %287 = vsyncpa [#allocation3], 1 }

</bundles_post_ra>
